<compile_context>
chip_gen: v7x
topology: tpu7x:2x2x1
jax: 0.10.0
libtpu: 0.0.40
codegen_flags: <defaults>
</compile_context>

<pallas_src>
import jax
import jax.numpy as jnp
from jax.experimental import pallas as pl
from jax.experimental.pallas import tpu as pltpu


def _round_up(x, m):
    return ((x + m - 1) // m) * m


def _make_kernel(TM, Cout, num_blocks):
    assert Cout % 8 == 0

    def conv_max_kernel(w_ref, p_ref, o_ref, run_ref):
        i = pl.program_id(0)

        # (Cout, K_pad) @ (K_pad, TM) on the MXU, f32 accumulate, lane-dense in M.
        # bias - noise rides along as one extra contraction row (ones row in pT).
        # MXU utilization is tiny but irrelevant: the kernel is HBM/overhead bound.
        v = jnp.dot(w_ref[...], p_ref[...], preferred_element_type=jnp.float32)

        # fold Cout rows down to 8 sublanes -> (8, TM)
        r = v[0:8]
        for c in range(8, Cout, 8):
            r = jnp.maximum(r, v[c:c + 8])

        # fold lanes down to a single 128-wide tile -> (8, 128); aligned VPU maxima that
        # ride in slack while the kernel streams pT.
        r128 = r[:, 0:128]
        for c in range(128, TM, 128):
            r128 = jnp.maximum(r128, r[:, c:c + 128])

        # running max across M blocks (accumulator lives in VMEM scratch)
        @pl.when(i == 0)
        def _():
            run_ref[...] = r128

        @pl.when(i > 0)
        def _():
            run_ref[...] = jnp.maximum(run_ref[...], r128)

        # last block: collapse to a scalar and write the single SMEM output
        @pl.when(i == num_blocks - 1)
        def _():
            o_ref[0, 0] = jnp.max(run_ref[...])

    return conv_max_kernel


def model_forward(x, weight, bias, noise_c):
    """x: (N, Cin, H, W) f32 NCHW. Returns scalar max of (conv(x) + bias - noise_c)."""
    N, C, H, W = x.shape
    Cout, Cin, KH, KW = weight.shape
    assert C == Cin and Cout % 8 == 0
    stride, pad = 2, 1
    OH = (H + 2 * pad - KH) // stride + 1
    OW = (W + 2 * pad - KW) // stride + 1
    M = N * OH * OW
    K = C * KH * KW

    # ---- glue: im2col, built directly transposed so M lands on the lane axis ----
    # TODO(synk): at large shapes this XLA-materialized im2col (~2.25x the input bytes,
    # written then re-read) should be replaced by in-kernel window gathers; stride-2
    # windows are not expressible via a BlockSpec index_map, so the layout prep stays in
    # XLA here (it is fused into few ops under jit and is negligible at these shapes).
    x_pad = jnp.pad(x, ((0, 0), (0, 0), (pad, pad), (pad, pad)))
    cols = []
    for kh in range(KH):
        for kw in range(KW):
            cols.append(
                x_pad[:, :, kh:kh + stride * OH:stride, kw:kw + stride * OW:stride]
            )  # (N, C, OH, OW)
    patches = jnp.stack(cols, axis=2)                       # (N, C, KH*KW, OH, OW)
    pT = patches.transpose(1, 2, 0, 3, 4).reshape(K, M)     # (K, M): K sublanes, M lanes

    # Fold bias - noise into the contraction: constant-1 row in pT, matching column in wT.
    pT = jnp.concatenate([pT, jnp.ones((1, M), pT.dtype)], axis=0)             # (K+1, M)
    wT = jnp.concatenate(
        [weight.reshape(Cout, K), (bias - noise_c).reshape(Cout, 1)], axis=1)  # (Cout, K+1)

    K_pad = _round_up(K + 1, 8)                 # 28 -> 32, sublane aligned
    TM = min(8192, _round_up(M, 128))           # big lane-dense tiles amortize step overhead
    M_pad = _round_up(M, TM)
    num_blocks = M_pad // TM

    # Zero-pad extra K rows (inert: the matching wT columns are zero), then edge-replicate
    # the last valid column across padded M columns so no in-kernel mask is needed
    # (replicated valid values cannot change the global max).
    pT = jnp.pad(pT, ((0, K_pad - (K + 1)), (0, 0)))
    wT = jnp.pad(wT, ((0, 0), (0, K_pad - (K + 1))))
    pT = jnp.pad(pT, ((0, 0), (0, M_pad - M)), mode="edge")

    kernel = _make_kernel(TM, Cout, num_blocks)
    # TODO(synk): on v7x at very large M a per-block-partials variant with a "parallel"
    # M axis (num_blocks even) would shard across the 2 TensorCores; the accumulator form
    # below is the right choice for 1-TC chips (v5e/v6e) and for the shapes exercised here.
    out = pl.pallas_call(
        kernel,
        out_shape=jax.ShapeDtypeStruct((1, 1), jnp.float32),
        grid_spec=pltpu.PrefetchScalarGridSpec(
            num_scalar_prefetch=0,
            grid=(num_blocks,),
            in_specs=[
                pl.BlockSpec((Cout, K_pad), lambda i: (0, 0)),  # weights (+ fused bias-noise), resident
                pl.BlockSpec((K_pad, TM), lambda i: (0, i)),    # patches, streamed over M
            ],
            out_specs=pl.BlockSpec(memory_space=pltpu.MemorySpace.SMEM),   # (1,1) scalar result
            scratch_shapes=[pltpu.VMEM((8, 128), jnp.float32)],            # running-max accumulator
        ),
        compiler_params=pltpu.CompilerParams(
            dimension_semantics=("arbitrary",),   # cross-block running max -> sequential M axis
        ),
    )(wT, pT)
    return out[0, 0]


if __name__ == "__main__":
    key = jax.random.PRNGKey(0)
    kx, kw, kb, kn = jax.random.split(key, 4)

    # Small shapes consistent with the module: batch=2, Cin=3, spatial=16, Cout=16
    N, C, H, W = 2, 3, 16, 16
    Cout, KH, KW = 16, 3, 3

    x = jax.random.normal(kx, (N, C, H, W), dtype=jnp.float32)
    weight = jax.random.normal(kw, (Cout, C, KH, KW), dtype=jnp.float32) * 0.1
    bias = jax.random.normal(kb, (Cout,), dtype=jnp.float32) * 0.1
    # TODO(synk): the original `v1 - torch.randn(16, 3, 3, 3)` is an invalid broadcast in
    # PyTorch ((1,16,OH,OW) vs (16,3,3,3)); we substitute well-defined per-output-channel
    # noise of shape (16,) subtracted from the conv output.
    noise_c = jax.random.normal(kn, (Cout,), dtype=jnp.float32)

    fwd = jax.jit(model_forward)
    result = jax.block_until_ready(fwd(x, weight, bias, noise_c))

    # sanity check against pure-JAX reference conv
    ref = jax.lax.conv_general_dilated(
        x, weight, window_strides=(2, 2), padding=((1, 1), (1, 1)),
        dimension_numbers=("NCHW", "OIHW", "NCHW"),
    ) + bias.reshape(1, Cout, 1, 1)
    ref_max = jnp.max(ref - noise_c.reshape(1, Cout, 1, 1))
    assert jnp.allclose(result, ref_max, rtol=1e-5, atol=1e-5), (result, ref_max)

    print("KERNEL_OK")
</pallas_src>

<mosaic_0001>
module attributes {stable_mosaic.version = 11 : i64} {
  func.func @conv_max_kernel(%arg0: i32, %arg1: memref<16x32xf32, #tpu.memory_space<vmem>>, %arg2: memref<32x128xf32, #tpu.memory_space<vmem>>, %arg3: memref<1x1xf32, #tpu.memory_space<smem>>, %arg4: memref<8x128xf32, #tpu.memory_space<vmem>>) attributes {dimension_semantics = [#tpu.dimension_semantics<arbitrary>], iteration_bounds = array<i64: 1>, scalar_prefetch = 0 : i64, scratch_operands = 1 : i64, tpu.core_type = #tpu.core_type<tc>, window_params = [{pipeline_mode = #tpu.pipeline_mode<synchronous>, transform_indices = @transform_0, window_bounds = array<i64: 16, 32>}, {transform_indices = @transform_1, window_bounds = array<i64: 32, 128>}, {transform_indices = @transform_2, window_bounds = array<i64: 1, 1>}]} {
    %c0 = arith.constant 0 : index
    %c0_0 = arith.constant 0 : index
    %0 = vector.load %arg1[%c0, %c0_0] : memref<16x32xf32, #tpu.memory_space<vmem>>, vector<16x32xf32>
    %c0_1 = arith.constant 0 : index
    %c0_2 = arith.constant 0 : index
    %1 = vector.load %arg2[%c0_1, %c0_2] : memref<32x128xf32, #tpu.memory_space<vmem>>, vector<32x128xf32>
    %cst = arith.constant dense<0.000000e+00> : vector<16x128xf32>
    %2 = tpu.matmul %0, %1, %cst {dimension_numbers = #tpu.dot_dimension_numbers<[1], [0], [0], [1], [0, 0, 1, 1], [], []>} : vector<16x32xf32>, vector<32x128xf32>, vector<16x128xf32> -> vector<16x128xf32>
    %3 = vector.extract_strided_slice %2 {offsets = [0, 0], sizes = [8, 128], strides = [1, 1]} : vector<16x128xf32> to vector<8x128xf32>
    %4 = vector.extract_strided_slice %2 {offsets = [8, 0], sizes = [8, 128], strides = [1, 1]} : vector<16x128xf32> to vector<8x128xf32>
    %5 = arith.maximumf %3, %4 : vector<8x128xf32>
    %c0_i32 = arith.constant 0 : i32
    %6 = arith.cmpi eq, %arg0, %c0_i32 : i32
    %7 = arith.extui %6 : i1 to i32
    %c0_i32_3 = arith.constant 0 : i32
    %8 = arith.cmpi ne, %7, %c0_i32_3 : i32
    scf.if %8 {
      %c0_8 = arith.constant 0 : index
      %c0_9 = arith.constant 0 : index
      %15 = vector.load %arg4[%c0_8, %c0_9] : memref<8x128xf32, #tpu.memory_space<vmem>>, vector<8x128xf32>
      tpu.vector_store %arg4[%c0_8, %c0_9], %5 {strides = array<i32>} : memref<8x128xf32, #tpu.memory_space<vmem>>, vector<8x128xf32>,
    } else {
    }
    %c0_i32_4 = arith.constant 0 : i32
    %9 = arith.cmpi sgt, %arg0, %c0_i32_4 : i32
    %10 = arith.extui %9 : i1 to i32
    %c0_i32_5 = arith.constant 0 : i32
    %11 = arith.cmpi ne, %10, %c0_i32_5 : i32
    scf.if %11 {
      %c0_8 = arith.constant 0 : index
      %c0_9 = arith.constant 0 : index
      %15 = vector.load %arg4[%c0_8, %c0_9] : memref<8x128xf32, #tpu.memory_space<vmem>>, vector<8x128xf32>
      %16 = arith.maximumf %15, %5 : vector<8x128xf32>
      %c0_10 = arith.constant 0 : index
      %c0_11 = arith.constant 0 : index
      %17 = vector.load %arg4[%c0_10, %c0_11] : memref<8x128xf32, #tpu.memory_space<vmem>>, vector<8x128xf32>
      tpu.vector_store %arg4[%c0_10, %c0_11], %16 {strides = array<i32>} : memref<8x128xf32, #tpu.memory_space<vmem>>, vector<8x128xf32>,
    } else {
    }
    %c0_i32_6 = arith.constant 0 : i32
    %12 = arith.cmpi eq, %arg0, %c0_i32_6 : i32
    %13 = arith.extui %12 : i1 to i32
    %c0_i32_7 = arith.constant 0 : i32
    %14 = arith.cmpi ne, %13, %c0_i32_7 : i32
    scf.if %14 {
      %c0_8 = arith.constant 0 : index
      %c0_9 = arith.constant 0 : index
      %15 = vector.load %arg4[%c0_8, %c0_9] : memref<8x128xf32, #tpu.memory_space<vmem>>, vector<8x128xf32>
      %16 = vector.shape_cast %15 : vector<8x128xf32> to vector<1x8x128xf32>
      %cst_10 = arith.constant dense<0xFF800000> : vector<1xf32>
      %17 = vector.multi_reduction <maximumf>, %16, %cst_10 [1, 2] : vector<1x8x128xf32> to vector<1xf32>
      %18 = vector.shape_cast %17 : vector<1xf32> to vector<1x1x1xf32>
      %19 = vector.extract %18[0, 0, 0] : f32 from vector<1x1x1xf32>
      %c0_11 = arith.constant 0 : index
      %c0_12 = arith.constant 0 : index
      %20 = memref.load %arg3[%c0_11, %c0_12] : memref<1x1xf32, #tpu.memory_space<smem>>
      memref.store %19, %arg3[%c0_11, %c0_12] : memref<1x1xf32, #tpu.memory_space<smem>>
    } else {
    }
    return
  }
  func.func @transform_0(%arg0: i32) -> (i32, i32) {
    %c0_i32 = arith.constant 0 : i32
    %c0_i32_0 = arith.constant 0 : i32
    %c0_i32_1 = arith.constant 0 : i32
    return %c0_i32, %c0_i32_0 : i32, i32
  }
  func.func @transform_1(%arg0: i32) -> (i32, i32) {
    %c0_i32 = arith.constant 0 : i32
    %c0_i32_0 = arith.constant 0 : i32
    return %c0_i32, %arg0 : i32, i32
  }
  func.func @transform_2(%arg0: i32) -> (i32, i32) {
    %c0_i32 = arith.constant 0 : i32
    %c0_i32_0 = arith.constant 0 : i32
    %c0_i32_1 = arith.constant 0 : i32
    return %c0_i32, %c0_i32_0 : i32, i32
  }
}

</mosaic_0001>

<bundles_post_ra>
// kernel: model_forward.1
= control target key start
LH: loop header
LB: loop body
LE: loop exit
PB: predicated region body
PF: predicated region fallthrough
CT: control target
= control target key end

     0   :  { %vm18_vm0 = vcmask 261120   ;;  %s229_s0 = inlined_call_operand.vmem [shape: f32[16,32], index: 0, kind: input, shape index: {}]   ;;  %s230_s1 = inlined_call_operand.vmem [shape: f32[32,128], index: 1, kind: input, shape index: {}]   ;;  %s231_s2 = inlined_call_operand.hbm [shape: f32[1,1], index: 2, kind: output, shape index: {}]  }
   0x1   :  { %v14_v0 = vld [vmem:[%s230_s1] sm:$0xff]  ;;  %v15_v1 = vld [vmem:[%s230_s1 + $0x8] sm:$0xff]  ;;  %v16_v2 = vld [vmem:[%s230_s1 + $0x10] sm:$0xff] }
   0x2   :  { %v160_v3 = vpack.c.bf16 %v15_v1, %v14_v0  ;;  %v17_v4 = vld [vmem:[%s230_s1 + $0x18] sm:$0xff]  ;;  %v12_v5 = vld [vmem:[%s229_s0] sm:$0xff] }
   0x3   :  { %v164_v6 = vpack.c.bf16 %v17_v4, %v16_v2  ;;  %157 = vmatprep.mubr.msk.f32.mxu0 %vm18_vm0, %v12_v5 }
   0x4   :  { %7 = vsyncpa [#allocation4], 0  ;;  %161 = vmatprep.subr.bf16.mxu0 %v160_v3  ;;  %v13_v7 = vld [vmem:[%s229_s0 + $0x8] sm:$0xff]  ;;  %s171_s23 = scalar_lea.hbm %s231_s2, 16 }
   0x5   :  { %163 = vmatpush3.bf16.msra.mxu0 %v160_v3  ;;  %p172_p0 = scmp.ne.s32.totalorder %s231_s2, %s171_s23  ;;  %p175_p1 = scmp.lt.u32.totalorder %s171_s23, %s231_s2 }
   0x6   :  { %165 = vmatprep.subr.bf16.mxu0 %v164_v6 }
   0x7   :  { %p177_p2 = pnand %p175_p1, %p172_p0 }
   0x9   :  { %167 = vmatpush3.bf16.msra.mxu0 %v164_v6 }
   0xc   :  { %158 = vmatmul.mubr.msk.f32.vlgmr.msra.gmra.mrb[0].mxu0 %vm18_vm0, %v13_v7 }
  0xdf   :  { %v159_v8 = vpop.f32.mrb[0].mxu0 }
  0xe0   :  { %v91_v9 = vpop.f32.mrb[1].mxu0 }
  0xe1   :  { %v100_v10 = vmax.f32 %v91_v9, %v159_v8 }
  0xe3   :  { %117 = vmax.xlane.f32.xlu0 %v100_v10 }
 0x170   :  { %v118_v11 = vpop.xlane.xlu0 %117 }
 0x171   :  { %v119_v12 = vrot.slane %v118_v11, 4 }
 0x173   :  { %v120_v13 = vmax.f32 %v118_v11, %v119_v12 }
 0x175   :  { %v121_v14 = vrot.slane %v120_v13, 2 }
 0x177   :  { %v122_v15 = vmax.f32 %v120_v13, %v121_v14 }
 0x179   :  { %v123_v16 = vrot.slane %v122_v15, 1 }
 0x17b   :  { %v124_v17 = vmax.f32 %v122_v15, %v123_v16 }
 0x17d   :  { %168 = vpush %v124_v17 }
 0x1ae   :  { %s169_s1 = spop %168 }
 0x1af   :  { %127 = sst [smem:[#allocation3]] %s169_s1 }
 0x1b0   :  { %180 = shalt.err (!%p177_p2)
}
 0x1b1   :  { %s183_s27 = smov [#allocation3]  }
 0x1b2   :  { %135 = dma.smem_to_hbm %s183_s27, 16, %s231_s2, [#allocation4]  }
 0x1b3   :  { %181 = dma.done.wait [#allocation4], 16  }
 0x1b4   :  { %182 = vsyncadd [#allocation4], 4294967280 }
 0x1b5   :  { %139 = sfence }
 0x1b6   :  { %140 = vsyncpa [#allocation4], 1 }

</bundles_post_ra>
